<compile_context>
chip_gen: v5e
topology: v5e:2x2
jax: 0.10.0
libtpu: 0.0.40
codegen_flags: <defaults>
</compile_context>

<pallas_src>
from functools import partial

import jax
import jax.numpy as jnp
from jax.experimental import pallas as pl
from jax.experimental.pallas import tpu as pltpu


def time2vec_kernel(tau_ref, w_ref, phi_ref, out_ref):
    tau = tau_ref[...]            # (TM, 1)
    w = w_ref[...]                # (1, Dp) fused weights (resident)
    phi = phi_ref[...]            # (1, Dp) fused phases  (resident)
    z = tau * w + phi             # (TM, Dp) broadcasted "matmul" (input_dim == 1)
    # (1, Dp) column index, broadcast by the where — avoids a full-tile iota.
    col = jax.lax.broadcasted_iota(jnp.int32, w.shape, 1)
    # column 0 is the linear term v1, columns 1..D-1 are cos(...) = v2.
    # Whole-vreg select: the wasted cos on lane 0 is 1/128 of VPU work and
    # keeps stores unmasked.
    out_ref[...] = jnp.where(col == 0, z, jnp.cos(z))


def fuse_params(w0, phi0, w, phi):
    """Fuse (w0, phi0) and (w, phi) into single (1, D) rows; column 0 = linear term."""
    D = w.shape[1] + 1
    w_full = jnp.concatenate(
        [w0.reshape(1, 1).astype(jnp.float32), w.reshape(1, D - 1).astype(jnp.float32)],
        axis=1)
    phi_full = jnp.concatenate(
        [phi0.reshape(1, 1).astype(jnp.float32), phi.reshape(1, D - 1).astype(jnp.float32)],
        axis=1)
    return w_full, phi_full


@partial(jax.jit, static_argnames=("tm",))
def time2vec_fused(tau, w_full, phi_full, *, tm=512):
    """tau: (B, S). w_full/phi_full: (1, D) fused params. Returns (B, S, D) f32."""
    B, S = tau.shape
    D = w_full.shape[1]
    M = B * S

    # Lane-pad D to a multiple of 128 -> unmasked, lane-dense output stores.
    Dp = ((D + 127) // 128) * 128
    if Dp != D:
        w_full = jnp.pad(w_full, ((0, 0), (0, Dp - D)))
        phi_full = jnp.pad(phi_full, ((0, 0), (0, Dp - D)))

    # Big row tile (default 512), clamped for small inputs; multiple of 8.
    tm_eff = min(tm, ((M + 7) // 8) * 8)
    Mp = ((M + tm_eff - 1) // tm_eff) * tm_eff          # pad instead of asserting

    tau_flat = tau.reshape(M, 1).astype(jnp.float32)
    if Mp != M:
        tau_flat = jnp.pad(tau_flat, ((0, Mp - M), (0, 0)))

    out = pl.pallas_call(
        time2vec_kernel,
        out_shape=jax.ShapeDtypeStruct((Mp, Dp), jnp.float32),
        grid=(Mp // tm_eff,),
        in_specs=[
            pl.BlockSpec((tm_eff, 1), lambda i: (i, 0)),   # tau rows
            pl.BlockSpec((1, Dp), lambda i: (0, 0)),       # fused weights (resident)
            pl.BlockSpec((1, Dp), lambda i: (0, 0)),       # fused phases  (resident)
        ],
        out_specs=pl.BlockSpec((tm_eff, Dp), lambda i: (i, 0)),
        compiler_params=pltpu.CompilerParams(
            dimension_semantics=("parallel",)),            # shards across v7x's 2 TCs
    )(tau_flat, w_full, phi_full)

    return out[:M, :D].reshape(B, S, D)


def make_time2vec(w0, phi0, w, phi, *, tm=512):
    """Hoist the parameter fusion out of the per-call path."""
    w_full, phi_full = fuse_params(w0, phi0, w, phi)
    return lambda tau: time2vec_fused(tau, w_full, phi_full, tm=tm)


def time2vec(tau, w0, phi0, w, phi, *, tm=512):
    """One-shot convenience wrapper (fusion happens per call)."""
    w_full, phi_full = fuse_params(w0, phi0, w, phi)
    return time2vec_fused(tau, w_full, phi_full, tm=tm)


def time2vec_ref(tau, w0, phi0, w, phi):
    """Pure-JAX reference mirroring the PyTorch forward exactly."""
    tau3 = tau[:, :, None]                                   # (B, S, 1)
    v1 = jnp.matmul(tau3, w0) + phi0                         # (B, S, 1)
    v2 = jnp.cos(jnp.matmul(tau3, w) + phi)                  # (B, S, D-1)
    return jnp.concatenate([v1, v2], axis=-1)


if __name__ == "__main__":
    key = jax.random.PRNGKey(0)

    # --- Test 1: demo shape, D multiple of 128, M not a multiple of tm -> padding path.
    B, S, D = 2, 8, 128
    k_tau, k_w0, k_phi0, k_w, k_phi, key = jax.random.split(key, 6)
    tau = jax.random.normal(k_tau, (B, S), dtype=jnp.float32)
    w0 = jax.random.normal(k_w0, (1, 1), dtype=jnp.float32)       # (input_dim, 1)
    phi0 = jax.random.normal(k_phi0, (1,), dtype=jnp.float32)     # (1,)
    w = jax.random.normal(k_w, (1, D - 1), dtype=jnp.float32)     # (input_dim, D-1)
    phi = jax.random.normal(k_phi, (D - 1,), dtype=jnp.float32)   # (D-1,)

    fn = make_time2vec(w0, phi0, w, phi)
    out = jax.block_until_ready(fn(tau))
    ref = time2vec_ref(tau, w0, phi0, w, phi)
    assert out.shape == (B, S, D)
    assert jnp.allclose(out, ref, atol=1e-5, rtol=1e-5), "mismatch vs reference (test 1)"

    # --- Test 2: ragged shape (M and D both need padding).
    B2, S2, D2 = 3, 5, 100
    k_tau2, k_w02, k_phi02, k_w2, k_phi2, key = jax.random.split(key, 6)
    tau2 = jax.random.normal(k_tau2, (B2, S2), dtype=jnp.float32)
    w02 = jax.random.normal(k_w02, (1, 1), dtype=jnp.float32)
    phi02 = jax.random.normal(k_phi02, (1,), dtype=jnp.float32)
    w2 = jax.random.normal(k_w2, (1, D2 - 1), dtype=jnp.float32)
    phi2 = jax.random.normal(k_phi2, (D2 - 1,), dtype=jnp.float32)

    out2 = jax.block_until_ready(time2vec(tau2, w02, phi02, w2, phi2))
    ref2 = time2vec_ref(tau2, w02, phi02, w2, phi2)
    assert out2.shape == (B2, S2, D2)
    assert jnp.allclose(out2, ref2, atol=1e-5, rtol=1e-5), "mismatch vs reference (test 2)"

    print("KERNEL_OK")
</pallas_src>

<mosaic_0001>
module attributes {stable_mosaic.version = 11 : i64} {
  func.func @time2vec_kernel(%arg0: i32, %arg1: memref<16x1xf32, #tpu.memory_space<vmem>>, %arg2: memref<1x128xf32, #tpu.memory_space<vmem>>, %arg3: memref<1x128xf32, #tpu.memory_space<vmem>>, %arg4: memref<16x128xf32, #tpu.memory_space<vmem>>) attributes {dimension_semantics = [#tpu.dimension_semantics<parallel>], iteration_bounds = array<i64: 1>, scalar_prefetch = 0 : i64, scratch_operands = 0 : i64, tpu.core_type = #tpu.core_type<tc>, window_params = [{transform_indices = @transform_0, window_bounds = array<i64: 16, 1>}, {pipeline_mode = #tpu.pipeline_mode<synchronous>, transform_indices = @transform_1, window_bounds = array<i64: 1, 128>}, {pipeline_mode = #tpu.pipeline_mode<synchronous>, transform_indices = @transform_2, window_bounds = array<i64: 1, 128>}, {transform_indices = @transform_3, window_bounds = array<i64: 16, 128>}]} {
    %c0 = arith.constant 0 : index
    %c0_0 = arith.constant 0 : index
    %0 = vector.load %arg1[%c0, %c0_0] : memref<16x1xf32, #tpu.memory_space<vmem>>, vector<16x1xf32>
    %c0_1 = arith.constant 0 : index
    %c0_2 = arith.constant 0 : index
    %1 = vector.load %arg2[%c0_1, %c0_2] : memref<1x128xf32, #tpu.memory_space<vmem>>, vector<1x128xf32>
    %c0_3 = arith.constant 0 : index
    %c0_4 = arith.constant 0 : index
    %2 = vector.load %arg3[%c0_3, %c0_4] : memref<1x128xf32, #tpu.memory_space<vmem>>, vector<1x128xf32>
    %3 = vector.broadcast %0 : vector<16x1xf32> to vector<16x128xf32>
    %4 = vector.broadcast %1 : vector<1x128xf32> to vector<16x128xf32>
    %5 = arith.mulf %3, %4 : vector<16x128xf32>
    %6 = vector.broadcast %2 : vector<1x128xf32> to vector<16x128xf32>
    %7 = arith.addf %5, %6 : vector<16x128xf32>
    %8 = tpu.iota {dimensions = array<i32: 1>} : vector<1x128xi32>
    %c0_i32 = arith.constant 0 : i32
    %9 = vector.broadcast %c0_i32 : i32 to vector<1x128xi32>
    %10 = arith.cmpi eq, %8, %9 : vector<1x128xi32>
    %11 = math.cos %7 : vector<16x128xf32>
    %12 = vector.shape_cast %10 : vector<1x128xi1> to vector<1x128xi1>
    %13 = vector.broadcast %12 : vector<1x128xi1> to vector<16x128xi1>
    %14 = arith.select %13, %7, %11 : vector<16x128xi1>, vector<16x128xf32>
    %c0_5 = arith.constant 0 : index
    %c0_6 = arith.constant 0 : index
    %15 = vector.load %arg4[%c0_5, %c0_6] : memref<16x128xf32, #tpu.memory_space<vmem>>, vector<16x128xf32>
    tpu.vector_store %arg4[%c0_5, %c0_6], %14 {strides = array<i32>} : memref<16x128xf32, #tpu.memory_space<vmem>>, vector<16x128xf32>,
    return
  }
  func.func @transform_0(%arg0: i32) -> (i32, i32) {
    %c0_i32 = arith.constant 0 : i32
    %c0_i32_0 = arith.constant 0 : i32
    return %arg0, %c0_i32 : i32, i32
  }
  func.func @transform_1(%arg0: i32) -> (i32, i32) {
    %c0_i32 = arith.constant 0 : i32
    %c0_i32_0 = arith.constant 0 : i32
    %c0_i32_1 = arith.constant 0 : i32
    return %c0_i32, %c0_i32_0 : i32, i32
  }
  func.func @transform_2(%arg0: i32) -> (i32, i32) {
    %c0_i32 = arith.constant 0 : i32
    %c0_i32_0 = arith.constant 0 : i32
    %c0_i32_1 = arith.constant 0 : i32
    return %c0_i32, %c0_i32_0 : i32, i32
  }
  func.func @transform_3(%arg0: i32) -> (i32, i32) {
    %c0_i32 = arith.constant 0 : i32
    %c0_i32_0 = arith.constant 0 : i32
    return %arg0, %c0_i32 : i32, i32
  }
}

</mosaic_0001>

<bundles_post_ra>
// kernel: time2vec_fused.1
= control target key start
LH: loop header
LB: loop body
LE: loop exit
PB: predicated region body
PF: predicated region fallthrough
CT: control target
= control target key end

     0   :  { %v419_v1 = vmov 0   ;;  %s629_s0 = inlined_call_operand.vmem [shape: f32[16,1], index: 0, kind: input, shape index: {}]   ;;  %s630_s1 = inlined_call_operand.vmem [shape: f32[1,128], index: 1, kind: input, shape index: {}]   ;;  %s631_s2 = inlined_call_operand.vmem [shape: f32[1,128], index: 2, kind: input, shape index: {}]   ;;  %s632_s3 = inlined_call_operand.hbm [shape: f32[16,128], index: 3, kind: output, shape index: {}]  }
   0x1   :  { %v15_v0 = vld [vmem:[%s629_s0] sm:$0xff]  ;;  %390 = vset.pattern.permute.xlu0 %v419_v1 }
   0x2   :  { %21 = vperm.xlu0 %390, %v15_v0  }
   0x3   :  { %8 = vsyncpa [#allocation3], 0  ;;  %v16_v2 = vld [vmem:[%s629_s0 + $0x8] sm:$0xff]  ;;  %v391_v3 = vld [vmem:[%s630_s1] ss:$0 sm:$0xff]  ;;  %s426_s0 = smov [#allocation2]  }
   0x4   :  { %v392_v4 = vld [vmem:[%s631_s2] ss:$0 sm:$0xff]  ;;  %v420_v28 = vmov 683565275   ;;  %v421_v30 = vmov 2475754826  }
   0x5   :  { %v422_v32 = vmov 2131351028   ;;  %v423_v34 = vmov 2102212464   ;;  %v424_v39 = vmov 920167782  }
   0x6   :  { %v425_v42 = vmov 1326507024   ;;  %s360_s1 = sshll.u32 %s426_s0, 4  ;;  %s362_s21 = sshll.u32 %s632_s3, 4  ;;  %s361_s1 = int_to_ptr.vmem [resolvable:$true] %s360_s1  ;;  %s363_s21 = int_to_ptr.hbm [resolvable:$true] %s362_s21 }
   0x7   :  { %s427_s22 = smov 128   ;;  %s428_s23 = smov 8  }
   0xa   :  { %26 = vperm.xlu0 %390, %v16_v2  }
  0x74   :  { %v22_v5 = vpop.permute.xlu0 %21 }
  0x75   :  { %v32_v6 = vmul.f32 %v391_v3, %v22_v5 }
  0x77   :  { %v462_v7 = vadd.f32 %v392_v4, %v32_v6 }
  0x79   :  { %v42_v8 = vand.u32 2147483647, %v462_v7  ;;  %v45_v9 = vand.u32 2139095040, %v462_v7 }
  0x7b   :  { %v46_v10 = vshrl.u32 %v45_v9, 23  ;;  %v49_v11 = vand.u32 8388607, %v42_v8 }
  0x7c   :  { %v27_v12 = vpop.permute.xlu0 %26 }
  0x7d   :  { %v374_v13 = vadd.s32 4294967169, %v46_v10  ;;  %v50_v14 = vor.u32 8388608, %v49_v11  ;;  %v33_v15 = vmul.f32 %v391_v3, %v27_v12 }
  0x7f   :  { %v52_v16 = vadd.s32 1, %v374_v13  ;;  %v468_v17 = vadd.f32 %v392_v4, %v33_v15  ;;  %v470_v18 = vshll.u32 %v50_v14, 8 }
  0x81   :  { %vm53_vm0 = vcmp.gt.s32.totalorder %v52_v16, 0  ;;  %v196_v19 = vand.u32 2147483647, %v468_v17  ;;  %v199_v21 = vand.u32 2139095040, %v468_v17  ;;  %v91_v25 = vand.u32 65535, %v470_v18 }
  0x82   :  { %v54_v20 = vsel %vm53_vm0, %v52_v16, 0  ;;  %v92_v0 = vshrl.u32 %v470_v18, 16 }
  0x83   :  { %v56_v22 = vand.u32 31, %v54_v20  ;;  %v55_v23 = vshrl.u32 %v54_v20, 5  ;;  %v200_v26 = vshrl.u32 %v199_v21, 23  ;;  %v203_v27 = vand.u32 8388607, %v196_v19 }
  0x85   :  { %v57_v24 = vsub.s32 32, %v56_v22  ;;  %v59_v29 = vshll.u32 %v420_v28, %v56_v22  ;;  %v62_v31 = vshll.u32 %v421_v30, %v56_v22  ;;  %v65_v33 = vshll.u32 %v422_v32, %v56_v22 }
  0x86   :  { %v68_v35 = vshll.u32 %v423_v34, %v56_v22  ;;  %v71_v40 = vshll.u32 %v424_v39, %v56_v22  ;;  %vm74_vm1 = vcmp.lt.s32.totalorder %v55_v23, 1  ;;  %vm75_vm2 = vcmp.lt.s32.totalorder %v55_v23, 2 }
  0x87   :  { %v60_v36 = vshrl.u32 %v421_v30, %v57_v24  ;;  %v63_v37 = vshrl.u32 %v422_v32, %v57_v24  ;;  %v66_v38 = vshrl.u32 %v423_v34, %v57_v24  ;;  %v69_v41 = vshrl.u32 %v424_v39, %v57_v24 }
  0x88   :  { %v72_v43 = vshrl.u32 %v425_v42, %v57_v24  ;;  %v377_v47 = vadd.s32 4294967169, %v200_v26  ;;  %v58_v48 = vshrl.u32 %v420_v28, %v57_v24  ;;  %vm77_vm3 = vcmp.lt.s32.totalorder %v55_v23, 4 }
  0x89   :  { %v61_v44 = vor.u32 %v60_v36, %v59_v29  ;;  %v64_v45 = vor.u32 %v63_v37, %v62_v31  ;;  %v67_v46 = vor.u32 %v66_v38, %v65_v33  ;;  %v70_v49 = vor.u32 %v69_v41, %v68_v35 }
  0x8a   :  { %v73_v50 = vor.u32 %v72_v43, %v71_v40  ;;  %vm76_vm4 = vcmp.lt.s32.totalorder %v55_v23, 3  ;;  %v204_v56 = vor.u32 8388608, %v203_v27  ;;  %v206_v57 = vadd.s32 1, %v377_v47 }
  0x8b   :  { %v79_v51 = vsel %vm77_vm3, %v67_v46, 2102212464  ;;  %v82_v52 = vsel %vm74_vm1, %v61_v44, %v64_v45  ;;  %v86_v53 = vsel %vm74_vm1, %v64_v45, %v67_v46  ;;  %v83_v54 = vsel %vm77_vm3, %v70_v49, 920167782 }
  0x8c   :  { %v87_v55 = vsel %vm77_vm3, %v73_v50, 1326507024  ;;  %v78_v58 = vsel %vm74_vm1, %v58_v48, %v61_v44  ;;  %v80_v59 = vsel %vm76_vm4, %v64_v45, %v79_v51  ;;  %v84_v60 = vsel %vm76_vm4, %v67_v46, %v83_v54 }
  0x8d   :  { %v88_v61 = vsel %vm76_vm4, %v70_v49, %v87_v55  ;;  %v85_v62 = vsel %vm75_vm2, %v82_v52, %v84_v60  ;;  %vm207_vm5 = vcmp.gt.s32.totalorder %v206_v57, 0  ;;  %v495_v6 = vsel %vm75_vm2, %v78_v58, %v80_v59 }
  0x8e   :  { %v89_v63 = vsel %vm75_vm2, %v86_v53, %v88_v61  ;;  %v115_v4 = vand.u32 65535, %v85_v62  ;;  %v116_v5 = vshrl.u32 %v85_v62, 16  ;;  %v208_v11 = vsel %vm207_vm5, %v206_v57, 0 }
  0x8f   :  { %v93_v2 = vand.u32 65535, %v89_v63  ;;  %v94_v3 = vshrl.u32 %v89_v63, 16  ;;  %v497_v12 = vshll.u32 %v204_v56, 8  ;;  %v210_v35 = vand.u32 31, %v208_v11 }
  0x90   :  { %v118_v15 = vmul.u32 %v116_v5, %v91_v25  ;;  %v119_v16 = vmul.u32 %v115_v4, %v92_v0  ;;  %v117_v22 = vmul.u32 %v115_v4, %v91_v25  ;;  %v120_v24 = vmul.u32 %v116_v5, %v92_v0 }
  0x91   :  { %v96_v9 = vmul.u32 %v94_v3, %v91_v25  ;;  %v97_v10 = vmul.u32 %v93_v2, %v92_v0  ;;  %v95_v13 = vmul.u32 %v93_v2, %v91_v25  ;;  %v98_v14 = vmul.u32 %v94_v3, %v92_v0 }
  0x92   :  { %v121_v29 = vshll.u32 %v118_v15, 16  ;;  %v122_v31 = vshrl.u32 %v118_v15, 16  ;;  %v123_v33 = vshll.u32 %v119_v16, 16  ;;  %v124_v37 = vshrl.u32 %v119_v16, 16 }
  0x93   :  { %v99_v20 = vshll.u32 %v96_v9, 16  ;;  %v100_v21 = vshrl.u32 %v96_v9, 16  ;;  %v101_v26 = vshll.u32 %v97_v10, 16  ;;  %v102_v27 = vshrl.u32 %v97_v10, 16 }
  0x94   :  { %vm125_vm7 = vc.u32 %v117_v22, %v121_v29  ;;  %v127_v38 = vadd.s32 %v121_v29, %v117_v22  ;;  %v501_v43 = vsub.s32 32, %v210_v35  ;;  %v504_v45 = vshrl.u32 %v208_v11, 5 }
  0x95   :  { %vm103_vm6 = vc.u32 %v95_v13, %v99_v20  ;;  %v105_v23 = vadd.s32 %v99_v20, %v95_v13  ;;  %v126_v41 = vsel %vm125_vm7, 1, %v419_v1  ;;  %v213_v49 = vshll.u32 %v420_v28, %v210_v35 }
  0x96   :  { %v104_v36 = vsel %vm103_vm6, 1, %v419_v1  ;;  %v128_v44 = vadd.s32 %v126_v41, %v120_v24  ;;  %vm129_vm9 = vc.u32 %v127_v38, %v123_v33  ;;  %v507_v48 = vadd.s32 %v127_v38, %v123_v33 }
  0x97   :  { %v106_v40 = vadd.s32 %v104_v36, %v98_v14  ;;  %vm107_vm8 = vc.u32 %v105_v23, %v101_v26  ;;  %v130_v47 = vsel %vm129_vm9, 1, %v419_v1  ;;  %v214_v51 = vshrl.u32 %v421_v30, %v501_v43 }
  0x98   :  { %v108_v25 = vsel %vm107_vm8, 1, %v419_v1  ;;  %v132_v50 = vadd.s32 %v130_v47, %v128_v44  ;;  %v216_v52 = vshll.u32 %v421_v30, %v210_v35  ;;  %v217_v53 = vshrl.u32 %v422_v32, %v501_v43 }
  0x99   :  { %v110_v46 = vadd.s32 %v108_v25, %v106_v40  ;;  %v219_v55 = vshll.u32 %v422_v32, %v210_v35  ;;  %v220_v56 = vshrl.u32 %v423_v34, %v501_v43  ;;  %v222_v57 = vshll.u32 %v423_v34, %v210_v35 }
  0x9a   :  { %v133_v58 = vadd.s32 %v132_v50, %v122_v31  ;;  %v519_v59 = vor.u32 %v214_v51, %v213_v49  ;;  %v521_v60 = vor.u32 %v217_v53, %v216_v52  ;;  %v223_v61 = vshrl.u32 %v424_v39, %v501_v43 }
  0x9b   :  { %v111_v54 = vadd.s32 %v110_v46, %v100_v21  ;;  %v221_v62 = vor.u32 %v220_v56, %v219_v55  ;;  %v225_v63 = vshll.u32 %v424_v39, %v210_v35  ;;  %v226_v32 = vshrl.u32 %v425_v42, %v501_v43 }
  0x9c   :  { %v134_v0 = vadd.s32 %v133_v58, %v124_v37  ;;  %v224_v2 = vor.u32 %v223_v61, %v222_v57  ;;  %v135_v34 = vmul.u32 %v470_v18, %v495_v6  ;;  %vm228_vm11 = vcmp.lt.s32.totalorder %v504_v45, 1 }
  0x9d   :  { %v525_v30 = vadd.s32 %v111_v54, %v102_v27  ;;  %v227_v3 = vor.u32 %v226_v32, %v225_v63  ;;  %vm231_vm12 = vcmp.lt.s32.totalorder %v504_v45, 4  ;;  %v236_v39 = vsel %vm228_vm11, %v519_v59, %v521_v60 }
  0x9e   :  { %v138_v4 = vadd.s32 1, %v134_v0  ;;  %v245_v42 = vand.u32 65535, %v497_v12  ;;  %vm230_vm13 = vcmp.lt.s32.totalorder %v504_v45, 3  ;;  %v237_v18 = vsel %vm231_vm12, %v224_v2, 920167782 }
  0x9f   :  { %vm137_vm10 = vc.u32 %v525_v30, %v507_v48  ;;  %v240_v5 = vsel %vm228_vm11, %v521_v60, %v221_v62  ;;  %v241_v6 = vsel %vm231_vm12, %v227_v3, 1326507024  ;;  %vm229_vm14 = vcmp.lt.s32.totalorder %v504_v45, 2 }
  0xa0   :  { %v139_v9 = vsel %vm137_vm10, %v138_v4, %v134_v0  ;;  %v238_v10 = vsel %vm230_vm13, %v221_v62, %v237_v18  ;;  %v242_v11 = vsel %vm230_vm13, %v224_v2, %v241_v6  ;;  %v246_v16 = vshrl.u32 %v497_v12, 16 }
  0xa1   :  { %v140_v13 = vadd.s32 %v139_v9, %v135_v34  ;;  %v239_v14 = vsel %vm229_vm14, %v236_v39, %v238_v10  ;;  %v243_v15 = vsel %vm229_vm14, %v240_v5, %v242_v11  ;;  %v233_v38 = vsel %vm231_vm12, %v221_v62, 2102212464 }
  0xa2   :  { %v247_v20 = vand.u32 65535, %v243_v15  ;;  %v248_v21 = vshrl.u32 %v243_v15, 16  ;;  %v269_v22 = vand.u32 65535, %v239_v14  ;;  %v270_v24 = vshrl.u32 %v239_v14, 16 }
  0xa3   :  { %v141_v26 = vadd.s32 536870912, %v140_v13  ;;  %v212_v63 = vshrl.u32 %v420_v28, %v501_v43  ;;  %v136_v11 = vadd.s32 %v507_v48, %v525_v30  ;;  %vm44_vm6 = vcmp.lt.s32.totalorder %v462_v7, 0 }
  0xa4   :  { %v250_v27 = vmul.u32 %v248_v21, %v245_v42  ;;  %v251_v29 = vmul.u32 %v247_v20, %v246_v16  ;;  %v272_v23 = vmul.u32 %v270_v24, %v245_v42  ;;  %v273_v33 = vmul.u32 %v269_v22, %v246_v16 }
  0xa5   :  { %v559_v31 = vshrl.u32 %v141_v26, 30  ;;  %v249_v35 = vmul.u32 %v247_v20, %v245_v42  ;;  %v252_v40 = vmul.u32 %v248_v21, %v246_v16  ;;  %v271_v46 = vmul.u32 %v269_v22, %v245_v42 }
  0xa6   :  { %v253_v36 = vshll.u32 %v250_v27, 16  ;;  %v275_v41 = vshll.u32 %v272_v23, 16  ;;  %v255_v25 = vshll.u32 %v251_v29, 16  ;;  %v274_v50 = vmul.u32 %v270_v24, %v246_v16 }
  0xa7   :  { %v143_v37 = vshll.u32 %v559_v31, 30  ;;  %v277_v51 = vshll.u32 %v273_v33, 16  ;;  %v254_v57 = vshrl.u32 %v250_v27, 16  ;;  %v256_v32 = vshrl.u32 %v251_v29, 16 }
  0xa8   :  { %vm257_vm15 = vc.u32 %v249_v35, %v253_v36  ;;  %v259_v44 = vadd.s32 %v253_v36, %v249_v35  ;;  %vm279_vm1 = vc.u32 %v271_v46, %v275_v41  ;;  %v281_v53 = vadd.s32 %v275_v41, %v271_v46 }
  0xa9   :  { %v144_v47 = vsub.s32 %v140_v13, %v143_v37  ;;  %v258_v49 = vsel %vm257_vm15, 1, %v419_v1  ;;  %v280_v56 = vsel %vm279_vm1, 1, %v419_v1  ;;  %v276_v3 = vshrl.u32 %v272_v23, 16 }
  0xaa   :  { %v260_v52 = vadd.s32 %v258_v49, %v252_v40  ;;  %vm261_vm0 = vc.u32 %v259_v44, %v255_v25  ;;  %v282_v61 = vadd.s32 %v280_v56, %v274_v50  ;;  %vm283_vm3 = vc.u32 %v281_v53, %v277_v51 }
  0xab   :  { %vm145_vm2 = vcmp.lt.s32.totalorder %v144_v47, 0  ;;  %v146_v54 = vsub.s32 0, %v144_v47  ;;  %v262_v55 = vsel %vm261_vm0, 1, %v419_v1  ;;  %v284_v0 = vsel %vm283_vm3, 1, %v419_v1 }
  0xac   :  { %v264_v58 = vadd.s32 %v262_v55, %v260_v52  ;;  %v286_v4 = vadd.s32 %v284_v0, %v282_v61  ;;  %v232_v39 = vsel %vm228_vm11, %v212_v63, %v519_v59  ;;  %v234_v42 = vsel %vm230_vm13, %v521_v60, %v233_v38 }
  0xad   :  { %v147_v62 = vsel %vm145_vm2, %v146_v54, %v144_v47  ;;  %v278_v6 = vshrl.u32 %v273_v33, 16  ;;  %v285_v28 = vadd.s32 %v281_v53, %v277_v51  ;;  %v235_v1 = vsel %vm229_vm14, %v232_v39, %v234_v42 }
  0xae   :  { %v148_v2 = vclz %v147_v62  ;;  %v265_v34 = vadd.s32 %v264_v58, %v254_v57  ;;  %v287_v9 = vadd.s32 %v286_v4, %v276_v3  ;;  %v289_v60 = vmul.u32 %v497_v12, %v235_v1 }
  0xaf   :  { %vm587_vm8 = vcmp.le.f32.partialorder %v42_v8, 0.7853982  ;;  %v166_v46 = vsub.s32 4, %v559_v31  ;;  %v39_v39 = vlaneseq  ;;  %vm198_vm14 = vcmp.lt.s32.totalorder %v468_v17, 0 }
  0xb0   :  { %v375_v18 = vadd.s32 4294967294, %v148_v2  ;;  %v266_v5 = vadd.s32 %v265_v34, %v256_v32  ;;  %v288_v43 = vadd.s32 %v287_v9, %v278_v6  ;;  %vm185_vm15 = vweird.f32 %v462_v7 }
  0xb1   :  { %v167_v52 = vsel %vm44_vm6, %v166_v46, %v559_v31  ;;  %vm606_vm0 = vcmp.le.f32.partialorder %v196_v19, 0.7853982 }
  0xb2   :  { %vm376_vm4 = vcmp.lt.s32.totalorder %v375_v18, 0  ;;  %vm291_vm5 = vc.u32 %v266_v5, %v285_v28  ;;  %v292_v14 = vadd.s32 1, %v288_v43  ;;  %v290_v55 = vadd.s32 %v285_v28, %v266_v5 }
  0xb3   :  { %v151_v10 = vsel %vm376_vm4, 0, %v375_v18  ;;  %v169_v0 = vsel %vm587_vm8, 0, %v167_v52  ;;  %vm339_vm4 = vweird.f32 %v468_v17 }
  0xb4   :  { %v152_v59 = vsub.s32 32, %v151_v10  ;;  %v156_v13 = vsub.s32 4294967266, %v151_v10  ;;  %v153_v15 = vshll.u32 %v144_v47, %v151_v10  ;;  %v293_v21 = vsel %vm291_vm5, %v292_v14, %v288_v43 }
  0xb5   :  { %v294_v22 = vadd.s32 %v293_v21, %v289_v60  ;;  %v186_v5 = vand.u32 3, %v169_v0  ;;  %v40_v43 = vand.u32 127, %v39_v39 }
  0xb6   :  { %v154_v16 = vshrl.u32 %v136_v11, %v152_v59  ;;  %v157_v20 = vadd.s32 127, %v156_v13 }
  0xb7   :  { %v295_v45 = vadd.s32 536870912, %v294_v22  ;;  %vm187_vm10 = vcmp.lt.s32.totalorder %v186_v5, 2  ;;  %vm188_vm11 = vcmp.eq.s32.totalorder %v186_v5, 0  ;;  %vm191_vm12 = vcmp.eq.s32.totalorder %v186_v5, 2 }
  0xb8   :  { %v155_v24 = vor.u32 %v154_v16, %v153_v15  ;;  %v158_v26 = vshll.u32 %v157_v20, 23  ;;  %vm41_vm13 = vcmp.eq.s32.totalorder %v40_v43, 0 }
  0xb9   :  { %v581_v29 = vshrl.u32 %v295_v45, 30 }
  0xba   :  { %v159_v27 = vor.u32 4788187, %v158_v26  ;;  %v162_v33 = vcvt.s32.f32 %v155_v24 }
  0xbb   :  { %v297_v48 = vshll.u32 %v581_v29, 30  ;;  %v320_v19 = vsub.s32 4, %v581_v29 }
  0xbc   :  { %v160_v23 = vand.u32 2147483647, %v159_v27 }
  0xbd   :  { %v298_v35 = vsub.s32 %v294_v22, %v297_v48 }
  0xbe   :  { %v163_v30 = vmul.f32 %v162_v33, %v160_v23 }
  0xbf   :  { %vm299_vm7 = vcmp.lt.s32.totalorder %v298_v35, 0  ;;  %v300_v12 = vsub.s32 0, %v298_v35 }
  0xc0   :  { %v164_v36 = vxor.u32 2147483648, %v163_v30 }
  0xc1   :  { %v301_v41 = vsel %vm299_vm7, %v300_v12, %v298_v35 }
  0xc2   :  { %v165_v38 = vsel %vm44_vm6, %v164_v36, %v163_v30  ;;  %v302_v44 = vclz %v301_v41 }
  0xc3   :  { %v168_v40 = vsel %vm587_vm8, %v462_v7, %v165_v38 }
  0xc4   :  { %v170_v25 = vmul.f32 %v168_v40, %v168_v40  ;;  %v378_v49 = vadd.s32 4294967294, %v302_v44 }
  0xc6   :  { %v178_v47 = vmul.f32 -0.00019511016, %v170_v25  ;;  %v171_v50 = vmul.f32 -0.001358992, %v170_v25  ;;  %vm379_vm9 = vcmp.lt.s32.totalorder %v378_v49, 0 }
  0xc7   :  { %v305_v53 = vsel %vm379_vm9, 0, %v378_v49 }
  0xc8   :  { %v179_v51 = vadd.f32 0.008332121, %v178_v47  ;;  %v172_v8 = vadd.f32 0.041655596, %v171_v50  ;;  %v306_v56 = vsub.s32 32, %v305_v53  ;;  %v310_v57 = vsub.s32 4294967266, %v305_v53 }
  0xc9   :  { %v307_v62 = vshll.u32 %v298_v35, %v305_v53  ;;  %v321_v35 = vsel %vm198_vm14, %v320_v19, %v581_v29 }
  0xca   :  { %v180_v54 = vmul.f32 %v179_v51, %v170_v25  ;;  %v173_v58 = vmul.f32 %v172_v8, %v170_v25  ;;  %v308_v63 = vshrl.u32 %v290_v55, %v306_v56  ;;  %v311_v32 = vadd.s32 127, %v310_v57 }
  0xcc   :  { %v181_v61 = vadd.f32 -0.16666654, %v180_v54  ;;  %v174_v2 = vadd.f32 -0.4999988, %v173_v58  ;;  %v309_v3 = vor.u32 %v308_v63, %v307_v62  ;;  %v312_v4 = vshll.u32 %v311_v32, 23 }
  0xce   :  { %v182_v34 = vmul.f32 %v181_v61, %v170_v25  ;;  %v175_v42 = vmul.f32 %v174_v2, %v170_v25  ;;  %v313_v18 = vor.u32 4788187, %v312_v4  ;;  %v316_v1 = vcvt.s32.f32 %v309_v3 }
  0xd0   :  { %v183_v31 = vadd.f32 1.0, %v182_v34  ;;  %v176_v6 = vadd.f32 1.0, %v175_v42  ;;  %v314_v28 = vand.u32 2147483647, %v313_v18 }
  0xd2   :  { %v184_v9 = vmul.f32 %v183_v31, %v168_v40  ;;  %v192_v10 = vxor.u32 2147483648, %v176_v6  ;;  %v317_v11 = vmul.f32 %v316_v1, %v314_v28 }
  0xd4   :  { %v189_v59 = vxor.u32 2147483648, %v184_v9  ;;  %v318_v13 = vxor.u32 2147483648, %v317_v11  ;;  %v193_v60 = vsel %vm191_vm12, %v192_v10, %v184_v9 }
  0xd6   :  { %v190_v14 = vsel %vm188_vm11, %v176_v6, %v189_v59  ;;  %v319_v20 = vsel %vm198_vm14, %v318_v13, %v317_v11 }
  0xd7   :  { %v194_v15 = vsel %vm187_vm10, %v190_v14, %v193_v60  ;;  %v322_v22 = vsel %vm606_vm0, %v468_v17, %v319_v20 }
  0xd8   :  { %v195_v21 = vsel %vm185_vm15, nan, %v194_v15  ;;  %v324_v26 = vmul.f32 %v322_v22, %v322_v22 }
  0xd9   :  { %v352_v24 = vsel %vm41_vm13, %v462_v7, %v195_v21  ;;  %v323_v7 = vsel %vm606_vm0, 0, %v321_v35 }
  0xda   :  { %354 = vst [vmem:[#allocation2] sm:$0xff] %v352_v24  ;;  %v332_v45 = vmul.f32 -0.00019511016, %v324_v26  ;;  %v325_v27 = vmul.f32 -0.001358992, %v324_v26  ;;  %v340_v25 = vand.u32 3, %v323_v7 }
  0xdc   :  { %v333_v23 = vadd.f32 0.008332121, %v332_v45  ;;  %v326_v33 = vadd.f32 0.041655596, %v325_v27  ;;  %vm342_vm1 = vcmp.eq.s32.totalorder %v340_v25, 0  ;;  %vm345_vm2 = vcmp.eq.s32.totalorder %v340_v25, 2 }
  0xdd   :  { %vm341_vm3 = vcmp.lt.s32.totalorder %v340_v25, 2 }
  0xde   :  { %v334_v48 = vmul.f32 %v333_v23, %v324_v26  ;;  %v327_v30 = vmul.f32 %v326_v33, %v324_v26 }
  0xe0   :  { %v335_v36 = vadd.f32 -0.16666654, %v334_v48  ;;  %v328_v12 = vadd.f32 -0.4999988, %v327_v30 }
  0xe2   :  { %v336_v37 = vmul.f32 %v335_v36, %v324_v26  ;;  %v329_v38 = vmul.f32 %v328_v12, %v324_v26 }
  0xe4   :  { %v337_v40 = vadd.f32 1.0, %v336_v37  ;;  %v330_v41 = vadd.f32 1.0, %v329_v38 }
  0xe6   :  { %v338_v44 = vmul.f32 %v337_v40, %v322_v22  ;;  %v346_v46 = vxor.u32 2147483648, %v330_v41 }
  0xe8   :  { %v343_v47 = vxor.u32 2147483648, %v338_v44  ;;  %v347_v49 = vsel %vm345_vm2, %v346_v46, %v338_v44 }
  0xea   :  { %v344_v29 = vsel %vm342_vm1, %v330_v41, %v343_v47 }
  0xeb   :  { %v348_v50 = vsel %vm341_vm3, %v344_v29, %v347_v49 }
  0xec   :  { %v349_v51 = vsel %vm339_vm4, nan, %v348_v50 }
  0xed   :  { %v353_v8 = vsel %vm41_vm13, %v468_v17, %v349_v51 }
  0xee   :  { %355 = vst [vmem:[#allocation2 + $0x8] sm:$0xff] %v353_v8 }
  0xef   :  { %368 = dma.vmem_to_hbm [thread:$0]  %s361_s1, 256, %s363_s21, [#allocation3], %s427_s22, %s427_s22, %s428_s23  }
  0xf0   :  { %417 = dma.done.wait [#allocation3], 256  }
  0xf1   :  { %418 = vsyncadd [#allocation3], 4294967040 }
  0xf2   :  { %373 = vsyncpa [#allocation3], 1 }

</bundles_post_ra>
